<compile_context>
chip_gen: v6e
topology: v6e:2x2x1
jax: 0.10.0
libtpu: 0.0.40
codegen_flags: <defaults>
</compile_context>

<pallas_src>
import functools
import math

import jax
import jax.numpy as jnp
import numpy as np
from jax import lax
from jax.experimental import pallas as pl
from jax.experimental.pallas import tpu as pltpu


def _round_up(a, b):
    return pl.cdiv(a, b) * b


# ---------------------------------------------------------------------------
# Fast path: pe table resident in VMEM, in-kernel gather.
# ---------------------------------------------------------------------------
def _pe_vmem_gather_kernel(idx_ref, pe_ref, out_ref, *, pack):
    # idx_ref: SMEM (n_pad,) int32      -- scalar-prefetched flattened indices
    # pe_ref : VMEM (max_len, d_model)  -- whole table resident in VMEM
    # out_ref: VMEM (slab_rows, pack*d_model) -- lane-dense output block
    slab_rows = out_ref.shape[0]
    base = pl.program_id(0) * slab_rows * pack

    def body(q, carry):
        parts = []
        for p in range(pack):                      # pack is a static Python int
            row = idx_ref[base + q * pack + p]
            parts.append(pe_ref[pl.ds(row, 1), :])  # (1, d_model) dynamic slice
        packed = parts[0] if pack == 1 else jnp.concatenate(parts, axis=-1)
        out_ref[pl.ds(q, 1), :] = packed            # one full-lane store
        return carry

    lax.fori_loop(0, slab_rows, body, 0, unroll=8)


# ---------------------------------------------------------------------------
# Fallback: large table stays in HBM, per-row DMA gather directly into out_ref.
# ---------------------------------------------------------------------------
_DMA_WAVE = 8   # row DMAs kept in flight per wave


def _pe_dma_gather_kernel(idx_ref, pe_hbm, out_ref, sems):
    # idx_ref: SMEM (n_pad,) int32
    # pe_hbm : HBM  (max_len, d_model)  (memory_space=pl.ANY, never VMEM-resident)
    # out_ref: VMEM (rows, d_model)     -- DMAs land here directly (no staging)
    # sems   : DMA semaphores, shape (_DMA_WAVE,)
    rows = out_ref.shape[0]
    base = pl.program_id(0) * rows
    n_waves = rows // _DMA_WAVE

    # TODO(synk): waves are serialized; a double-buffered wave scheme (and
    # coalescing of contiguous index runs) would overlap DMA latency further.
    @pl.loop(0, n_waves)
    def _(w):
        r0 = w * _DMA_WAVE
        copies = []
        for c in range(_DMA_WAVE):
            row = idx_ref[base + r0 + c]
            cp = pltpu.make_async_copy(
                pe_hbm.at[pl.ds(row, 1)],
                out_ref.at[pl.ds(r0 + c, 1)],
                sems.at[c],
            )
            cp.start()
            copies.append(cp)
        for cp in copies:     # same descriptor object for start/wait
            cp.wait()


# ---------------------------------------------------------------------------
# Wrapper
# ---------------------------------------------------------------------------
def positional_encoding_lookup(x, pe, *, rows_per_step=512):
    """Equivalent of PositionalEncoding.forward: return pe[x]."""
    B, S = x.shape
    max_len, d_model = pe.shape
    n = B * S

    dtype_bytes = jnp.dtype(pe.dtype).itemsize
    table_bytes = max_len * d_model * dtype_bytes

    # Chip-aware VMEM gate (v7x has 64 MiB physical vs 128 MiB on v5e/v6e).
    try:
        vmem_cap = int(pltpu.get_tpu_info().vmem_capacity_bytes)
    except Exception:
        vmem_cap = 64 << 20          # conservative default: v7x physical VMEM
    vmem_budget = (vmem_cap // 2) - (4 << 20)   # leave room for pipeline bufs
    use_vmem_path = table_bytes <= vmem_budget

    # TODO(synk): PyTorch raises on out-of-range indices; we clamp instead so a
    # bad index can never turn into an out-of-bounds access.
    idx = jnp.clip(x.reshape(n).astype(jnp.int32), 0, max_len - 1)

    # TODO(synk): for very large B*S the whole index vector lands in SMEM via
    # scalar prefetch; it should then be fed per-block instead.

    if use_vmem_path:
        # Lane-packing factor: pack logical rows so each output row fills 128 lanes.
        pack = 128 // d_model if (d_model < 128 and 128 % d_model == 0) else 1
        step = 8 * pack                         # slab rows must be a multiple of 8
        rows = max(step, min(_round_up(rows_per_step, step), _round_up(n, step)))
        n_pad = _round_up(n, rows)
        idx_p = jnp.pad(idx, (0, n_pad - n))    # padding rows gather row 0
        slab_rows = rows // pack

        out_block_bytes = slab_rows * pack * d_model * dtype_bytes
        vmem_needed = 2 * table_bytes + 4 * out_block_bytes + (1 << 20)
        vmem_limit = None if vmem_needed <= (16 << 20) else int(min(vmem_cap, vmem_needed))

        out = pl.pallas_call(
            functools.partial(_pe_vmem_gather_kernel, pack=pack),
            out_shape=jax.ShapeDtypeStruct((n_pad // pack, pack * d_model), pe.dtype),
            grid_spec=pltpu.PrefetchScalarGridSpec(
                num_scalar_prefetch=1,                               # idx -> SMEM
                grid=(n_pad // rows,),
                in_specs=[pl.BlockSpec((max_len, d_model),
                                       lambda i, idx_ref: (0, 0))],  # table resident
                out_specs=pl.BlockSpec((slab_rows, pack * d_model),
                                       lambda i, idx_ref: (i, 0)),
            ),
            compiler_params=pltpu.CompilerParams(
                dimension_semantics=("parallel",),
                vmem_limit_bytes=vmem_limit),
        )(idx_p, pe)
        return out.reshape(n_pad, d_model)[:n].reshape(B, S, d_model)

    # ---- large-table fallback: DMA gather straight into the output block ----
    rows = max(_DMA_WAVE, min(_round_up(rows_per_step, _DMA_WAVE),
                              _round_up(n, _DMA_WAVE)))
    n_pad = _round_up(n, rows)
    idx_p = jnp.pad(idx, (0, n_pad - n))

    out = pl.pallas_call(
        _pe_dma_gather_kernel,
        out_shape=jax.ShapeDtypeStruct((n_pad, d_model), pe.dtype),
        grid_spec=pltpu.PrefetchScalarGridSpec(
            num_scalar_prefetch=1,
            grid=(n_pad // rows,),
            in_specs=[pl.BlockSpec(memory_space=pl.ANY)],   # pe stays in HBM
            out_specs=pl.BlockSpec((rows, d_model), lambda i, idx_ref: (i, 0)),
            scratch_shapes=[pltpu.SemaphoreType.DMA((_DMA_WAVE,))],
        ),
        compiler_params=pltpu.CompilerParams(
            dimension_semantics=("parallel",)),
    )(idx_p, pe)
    return out[:n].reshape(B, S, d_model)


def make_positional_encoding_table(d_model, max_len=1000):
    """Deterministic construction matching the PyTorch __init__ buffer."""
    position = np.arange(max_len, dtype=np.float32)[:, None]
    div_term = np.exp(np.arange(0, d_model, 2, dtype=np.float32)
                      * (-math.log(10000.0) / d_model))
    pe = np.zeros((max_len, d_model), dtype=np.float32)
    pe[:, 0::2] = np.sin(position * div_term)
    pe[:, 1::2] = np.cos(position * div_term)[:, : d_model // 2]
    return jnp.asarray(pe)


if __name__ == "__main__":
    d_model = 32
    max_len = 1000                    # module default
    pe = make_positional_encoding_table(d_model, max_len=max_len)

    key = jax.random.PRNGKey(0)
    k1, k2, k3 = jax.random.split(key, 3)

    # Main check: (B, S) = (2, 8), single grid step.
    B, S = 2, 8
    x = jax.random.randint(k1, (B, S), minval=0, maxval=max_len, dtype=jnp.int32)
    out = jax.block_until_ready(positional_encoding_lookup(x, pe))
    np.testing.assert_allclose(np.asarray(out), np.asarray(pe[x]), rtol=0, atol=0)
    assert out.shape == (B, S, d_model) and out.dtype == jnp.float32

    # Ragged check: B*S not a multiple of the row granularity (cdiv padding).
    B2, S2 = 2, 5
    x2 = jax.random.randint(k2, (B2, S2), minval=0, maxval=max_len, dtype=jnp.int32)
    out2 = jax.block_until_ready(positional_encoding_lookup(x2, pe))
    np.testing.assert_allclose(np.asarray(out2), np.asarray(pe[x2]), rtol=0, atol=0)

    # Multi-grid-step check: forces grid > 1 with a smaller rows_per_step.
    B3, S3 = 4, 100
    x3 = jax.random.randint(k3, (B3, S3), minval=0, maxval=max_len, dtype=jnp.int32)
    out3 = jax.block_until_ready(
        positional_encoding_lookup(x3, pe, rows_per_step=64))
    np.testing.assert_allclose(np.asarray(out3), np.asarray(pe[x3]), rtol=0, atol=0)

    print("KERNEL_OK")
</pallas_src>

<mosaic_0001>
module attributes {stable_mosaic.version = 11 : i64} {
  func.func @_pe_vmem_gather_kernel(%arg0: i32, %arg1: memref<32xi32, #tpu.memory_space<smem>>, %arg2: memref<1000x32xf32, #tpu.memory_space<vmem>>, %arg3: memref<8x128xf32, #tpu.memory_space<vmem>>) attributes {dimension_semantics = [#tpu.dimension_semantics<parallel>], iteration_bounds = array<i64: 1>, scalar_prefetch = 1 : i64, scratch_operands = 0 : i64, tpu.core_type = #tpu.core_type<tc>, window_params = [{pipeline_mode = #tpu.pipeline_mode<synchronous>, transform_indices = @transform_0, window_bounds = array<i64: 1000, 32>}, {transform_indices = @transform_1, window_bounds = array<i64: 8, 128>}]} {
    %c8_i32 = arith.constant 8 : i32
    %0 = arith.muli %arg0, %c8_i32 : i32
    %c4_i32 = arith.constant 4 : i32
    %1 = arith.muli %0, %c4_i32 : i32
    %c0_i32 = arith.constant 0 : i32
    %c4_i32_0 = arith.constant 4 : i32
    %2 = arith.muli %c0_i32, %c4_i32_0 : i32
    %3 = arith.addi %1, %2 : i32
    %c0_i32_1 = arith.constant 0 : i32
    %4 = arith.addi %3, %c0_i32_1 : i32
    %5 = arith.index_cast %4 : i32 to index
    %6 = memref.load %arg1[%5] : memref<32xi32, #tpu.memory_space<smem>>
    %7 = arith.index_cast %6 : i32 to index
    %c0 = arith.constant 0 : index
    %8 = vector.load %arg2[%7, %c0] : memref<1000x32xf32, #tpu.memory_space<vmem>>, vector<1x32xf32>
    %c4_i32_2 = arith.constant 4 : i32
    %9 = arith.muli %c0_i32, %c4_i32_2 : i32
    %10 = arith.addi %1, %9 : i32
    %c1_i32 = arith.constant 1 : i32
    %11 = arith.addi %10, %c1_i32 : i32
    %12 = arith.index_cast %11 : i32 to index
    %13 = memref.load %arg1[%12] : memref<32xi32, #tpu.memory_space<smem>>
    %14 = arith.index_cast %13 : i32 to index
    %c0_3 = arith.constant 0 : index
    %15 = vector.load %arg2[%14, %c0_3] : memref<1000x32xf32, #tpu.memory_space<vmem>>, vector<1x32xf32>
    %c4_i32_4 = arith.constant 4 : i32
    %16 = arith.muli %c0_i32, %c4_i32_4 : i32
    %17 = arith.addi %1, %16 : i32
    %c2_i32 = arith.constant 2 : i32
    %18 = arith.addi %17, %c2_i32 : i32
    %19 = arith.index_cast %18 : i32 to index
    %20 = memref.load %arg1[%19] : memref<32xi32, #tpu.memory_space<smem>>
    %21 = arith.index_cast %20 : i32 to index
    %c0_5 = arith.constant 0 : index
    %22 = vector.load %arg2[%21, %c0_5] : memref<1000x32xf32, #tpu.memory_space<vmem>>, vector<1x32xf32>
    %c4_i32_6 = arith.constant 4 : i32
    %23 = arith.muli %c0_i32, %c4_i32_6 : i32
    %24 = arith.addi %1, %23 : i32
    %c3_i32 = arith.constant 3 : i32
    %25 = arith.addi %24, %c3_i32 : i32
    %26 = arith.index_cast %25 : i32 to index
    %27 = memref.load %arg1[%26] : memref<32xi32, #tpu.memory_space<smem>>
    %28 = arith.index_cast %27 : i32 to index
    %c0_7 = arith.constant 0 : index
    %29 = vector.load %arg2[%28, %c0_7] : memref<1000x32xf32, #tpu.memory_space<vmem>>, vector<1x32xf32>
    %30 = tpu.concatenate %8, %15, %22, %29 in 1 : vector<1x32xf32>, vector<1x32xf32>, vector<1x32xf32>, vector<1x32xf32> -> vector<1x128xf32>
    %31 = arith.index_cast %c0_i32 : i32 to index
    %c0_8 = arith.constant 0 : index
    %32 = vector.load %arg3[%31, %c0_8] : memref<8x128xf32, #tpu.memory_space<vmem>>, vector<1x128xf32>
    tpu.vector_store %arg3[%31, %c0_8], %30 {strides = array<i32>} : memref<8x128xf32, #tpu.memory_space<vmem>>, vector<1x128xf32>,
    %c1_i32_9 = arith.constant 1 : i32
    %c4_i32_10 = arith.constant 4 : i32
    %33 = arith.muli %c1_i32_9, %c4_i32_10 : i32
    %34 = arith.addi %1, %33 : i32
    %c0_i32_11 = arith.constant 0 : i32
    %35 = arith.addi %34, %c0_i32_11 : i32
    %36 = arith.index_cast %35 : i32 to index
    %37 = memref.load %arg1[%36] : memref<32xi32, #tpu.memory_space<smem>>
    %38 = arith.index_cast %37 : i32 to index
    %c0_12 = arith.constant 0 : index
    %39 = vector.load %arg2[%38, %c0_12] : memref<1000x32xf32, #tpu.memory_space<vmem>>, vector<1x32xf32>
    %c4_i32_13 = arith.constant 4 : i32
    %40 = arith.muli %c1_i32_9, %c4_i32_13 : i32
    %41 = arith.addi %1, %40 : i32
    %c1_i32_14 = arith.constant 1 : i32
    %42 = arith.addi %41, %c1_i32_14 : i32
    %43 = arith.index_cast %42 : i32 to index
    %44 = memref.load %arg1[%43] : memref<32xi32, #tpu.memory_space<smem>>
    %45 = arith.index_cast %44 : i32 to index
    %c0_15 = arith.constant 0 : index
    %46 = vector.load %arg2[%45, %c0_15] : memref<1000x32xf32, #tpu.memory_space<vmem>>, vector<1x32xf32>
    %c4_i32_16 = arith.constant 4 : i32
    %47 = arith.muli %c1_i32_9, %c4_i32_16 : i32
    %48 = arith.addi %1, %47 : i32
    %c2_i32_17 = arith.constant 2 : i32
    %49 = arith.addi %48, %c2_i32_17 : i32
    %50 = arith.index_cast %49 : i32 to index
    %51 = memref.load %arg1[%50] : memref<32xi32, #tpu.memory_space<smem>>
    %52 = arith.index_cast %51 : i32 to index
    %c0_18 = arith.constant 0 : index
    %53 = vector.load %arg2[%52, %c0_18] : memref<1000x32xf32, #tpu.memory_space<vmem>>, vector<1x32xf32>
    %c4_i32_19 = arith.constant 4 : i32
    %54 = arith.muli %c1_i32_9, %c4_i32_19 : i32
    %55 = arith.addi %1, %54 : i32
    %c3_i32_20 = arith.constant 3 : i32
    %56 = arith.addi %55, %c3_i32_20 : i32
    %57 = arith.index_cast %56 : i32 to index
    %58 = memref.load %arg1[%57] : memref<32xi32, #tpu.memory_space<smem>>
    %59 = arith.index_cast %58 : i32 to index
    %c0_21 = arith.constant 0 : index
    %60 = vector.load %arg2[%59, %c0_21] : memref<1000x32xf32, #tpu.memory_space<vmem>>, vector<1x32xf32>
    %61 = tpu.concatenate %39, %46, %53, %60 in 1 : vector<1x32xf32>, vector<1x32xf32>, vector<1x32xf32>, vector<1x32xf32> -> vector<1x128xf32>
    %62 = arith.index_cast %c1_i32_9 : i32 to index
    %c0_22 = arith.constant 0 : index
    %63 = vector.load %arg3[%62, %c0_22] : memref<8x128xf32, #tpu.memory_space<vmem>>, vector<1x128xf32>
    tpu.vector_store %arg3[%62, %c0_22], %61 {strides = array<i32>} : memref<8x128xf32, #tpu.memory_space<vmem>>, vector<1x128xf32>,
    %c2_i32_23 = arith.constant 2 : i32
    %c4_i32_24 = arith.constant 4 : i32
    %64 = arith.muli %c2_i32_23, %c4_i32_24 : i32
    %65 = arith.addi %1, %64 : i32
    %c0_i32_25 = arith.constant 0 : i32
    %66 = arith.addi %65, %c0_i32_25 : i32
    %67 = arith.index_cast %66 : i32 to index
    %68 = memref.load %arg1[%67] : memref<32xi32, #tpu.memory_space<smem>>
    %69 = arith.index_cast %68 : i32 to index
    %c0_26 = arith.constant 0 : index
    %70 = vector.load %arg2[%69, %c0_26] : memref<1000x32xf32, #tpu.memory_space<vmem>>, vector<1x32xf32>
    %c4_i32_27 = arith.constant 4 : i32
    %71 = arith.muli %c2_i32_23, %c4_i32_27 : i32
    %72 = arith.addi %1, %71 : i32
    %c1_i32_28 = arith.constant 1 : i32
    %73 = arith.addi %72, %c1_i32_28 : i32
    %74 = arith.index_cast %73 : i32 to index
    %75 = memref.load %arg1[%74] : memref<32xi32, #tpu.memory_space<smem>>
    %76 = arith.index_cast %75 : i32 to index
    %c0_29 = arith.constant 0 : index
    %77 = vector.load %arg2[%76, %c0_29] : memref<1000x32xf32, #tpu.memory_space<vmem>>, vector<1x32xf32>
    %c4_i32_30 = arith.constant 4 : i32
    %78 = arith.muli %c2_i32_23, %c4_i32_30 : i32
    %79 = arith.addi %1, %78 : i32
    %c2_i32_31 = arith.constant 2 : i32
    %80 = arith.addi %79, %c2_i32_31 : i32
    %81 = arith.index_cast %80 : i32 to index
    %82 = memref.load %arg1[%81] : memref<32xi32, #tpu.memory_space<smem>>
    %83 = arith.index_cast %82 : i32 to index
    %c0_32 = arith.constant 0 : index
    %84 = vector.load %arg2[%83, %c0_32] : memref<1000x32xf32, #tpu.memory_space<vmem>>, vector<1x32xf32>
    %c4_i32_33 = arith.constant 4 : i32
    %85 = arith.muli %c2_i32_23, %c4_i32_33 : i32
    %86 = arith.addi %1, %85 : i32
    %c3_i32_34 = arith.constant 3 : i32
    %87 = arith.addi %86, %c3_i32_34 : i32
    %88 = arith.index_cast %87 : i32 to index
    %89 = memref.load %arg1[%88] : memref<32xi32, #tpu.memory_space<smem>>
    %90 = arith.index_cast %89 : i32 to index
    %c0_35 = arith.constant 0 : index
    %91 = vector.load %arg2[%90, %c0_35] : memref<1000x32xf32, #tpu.memory_space<vmem>>, vector<1x32xf32>
    %92 = tpu.concatenate %70, %77, %84, %91 in 1 : vector<1x32xf32>, vector<1x32xf32>, vector<1x32xf32>, vector<1x32xf32> -> vector<1x128xf32>
    %93 = arith.index_cast %c2_i32_23 : i32 to index
    %c0_36 = arith.constant 0 : index
    %94 = vector.load %arg3[%93, %c0_36] : memref<8x128xf32, #tpu.memory_space<vmem>>, vector<1x128xf32>
    tpu.vector_store %arg3[%93, %c0_36], %92 {strides = array<i32>} : memref<8x128xf32, #tpu.memory_space<vmem>>, vector<1x128xf32>,
    %c3_i32_37 = arith.constant 3 : i32
    %c4_i32_38 = arith.constant 4 : i32
    %95 = arith.muli %c3_i32_37, %c4_i32_38 : i32
    %96 = arith.addi %1, %95 : i32
    %c0_i32_39 = arith.constant 0 : i32
    %97 = arith.addi %96, %c0_i32_39 : i32
    %98 = arith.index_cast %97 : i32 to index
    %99 = memref.load %arg1[%98] : memref<32xi32, #tpu.memory_space<smem>>
    %100 = arith.index_cast %99 : i32 to index
    %c0_40 = arith.constant 0 : index
    %101 = vector.load %arg2[%100, %c0_40] : memref<1000x32xf32, #tpu.memory_space<vmem>>, vector<1x32xf32>
    %c4_i32_41 = arith.constant 4 : i32
    %102 = arith.muli %c3_i32_37, %c4_i32_41 : i32
    %103 = arith.addi %1, %102 : i32
    %c1_i32_42 = arith.constant 1 : i32
    %104 = arith.addi %103, %c1_i32_42 : i32
    %105 = arith.index_cast %104 : i32 to index
    %106 = memref.load %arg1[%105] : memref<32xi32, #tpu.memory_space<smem>>
    %107 = arith.index_cast %106 : i32 to index
    %c0_43 = arith.constant 0 : index
    %108 = vector.load %arg2[%107, %c0_43] : memref<1000x32xf32, #tpu.memory_space<vmem>>, vector<1x32xf32>
    %c4_i32_44 = arith.constant 4 : i32
    %109 = arith.muli %c3_i32_37, %c4_i32_44 : i32
    %110 = arith.addi %1, %109 : i32
    %c2_i32_45 = arith.constant 2 : i32
    %111 = arith.addi %110, %c2_i32_45 : i32
    %112 = arith.index_cast %111 : i32 to index
    %113 = memref.load %arg1[%112] : memref<32xi32, #tpu.memory_space<smem>>
    %114 = arith.index_cast %113 : i32 to index
    %c0_46 = arith.constant 0 : index
    %115 = vector.load %arg2[%114, %c0_46] : memref<1000x32xf32, #tpu.memory_space<vmem>>, vector<1x32xf32>
    %c4_i32_47 = arith.constant 4 : i32
    %116 = arith.muli %c3_i32_37, %c4_i32_47 : i32
    %117 = arith.addi %1, %116 : i32
    %c3_i32_48 = arith.constant 3 : i32
    %118 = arith.addi %117, %c3_i32_48 : i32
    %119 = arith.index_cast %118 : i32 to index
    %120 = memref.load %arg1[%119] : memref<32xi32, #tpu.memory_space<smem>>
    %121 = arith.index_cast %120 : i32 to index
    %c0_49 = arith.constant 0 : index
    %122 = vector.load %arg2[%121, %c0_49] : memref<1000x32xf32, #tpu.memory_space<vmem>>, vector<1x32xf32>
    %123 = tpu.concatenate %101, %108, %115, %122 in 1 : vector<1x32xf32>, vector<1x32xf32>, vector<1x32xf32>, vector<1x32xf32> -> vector<1x128xf32>
    %124 = arith.index_cast %c3_i32_37 : i32 to index
    %c0_50 = arith.constant 0 : index
    %125 = vector.load %arg3[%124, %c0_50] : memref<8x128xf32, #tpu.memory_space<vmem>>, vector<1x128xf32>
    tpu.vector_store %arg3[%124, %c0_50], %123 {strides = array<i32>} : memref<8x128xf32, #tpu.memory_space<vmem>>, vector<1x128xf32>,
    %c4_i32_51 = arith.constant 4 : i32
    %c4_i32_52 = arith.constant 4 : i32
    %126 = arith.muli %c4_i32_51, %c4_i32_52 : i32
    %127 = arith.addi %1, %126 : i32
    %c0_i32_53 = arith.constant 0 : i32
    %128 = arith.addi %127, %c0_i32_53 : i32
    %129 = arith.index_cast %128 : i32 to index
    %130 = memref.load %arg1[%129] : memref<32xi32, #tpu.memory_space<smem>>
    %131 = arith.index_cast %130 : i32 to index
    %c0_54 = arith.constant 0 : index
    %132 = vector.load %arg2[%131, %c0_54] : memref<1000x32xf32, #tpu.memory_space<vmem>>, vector<1x32xf32>
    %c4_i32_55 = arith.constant 4 : i32
    %133 = arith.muli %c4_i32_51, %c4_i32_55 : i32
    %134 = arith.addi %1, %133 : i32
    %c1_i32_56 = arith.constant 1 : i32
    %135 = arith.addi %134, %c1_i32_56 : i32
    %136 = arith.index_cast %135 : i32 to index
    %137 = memref.load %arg1[%136] : memref<32xi32, #tpu.memory_space<smem>>
    %138 = arith.index_cast %137 : i32 to index
    %c0_57 = arith.constant 0 : index
    %139 = vector.load %arg2[%138, %c0_57] : memref<1000x32xf32, #tpu.memory_space<vmem>>, vector<1x32xf32>
    %c4_i32_58 = arith.constant 4 : i32
    %140 = arith.muli %c4_i32_51, %c4_i32_58 : i32
    %141 = arith.addi %1, %140 : i32
    %c2_i32_59 = arith.constant 2 : i32
    %142 = arith.addi %141, %c2_i32_59 : i32
    %143 = arith.index_cast %142 : i32 to index
    %144 = memref.load %arg1[%143] : memref<32xi32, #tpu.memory_space<smem>>
    %145 = arith.index_cast %144 : i32 to index
    %c0_60 = arith.constant 0 : index
    %146 = vector.load %arg2[%145, %c0_60] : memref<1000x32xf32, #tpu.memory_space<vmem>>, vector<1x32xf32>
    %c4_i32_61 = arith.constant 4 : i32
    %147 = arith.muli %c4_i32_51, %c4_i32_61 : i32
    %148 = arith.addi %1, %147 : i32
    %c3_i32_62 = arith.constant 3 : i32
    %149 = arith.addi %148, %c3_i32_62 : i32
    %150 = arith.index_cast %149 : i32 to index
    %151 = memref.load %arg1[%150] : memref<32xi32, #tpu.memory_space<smem>>
    %152 = arith.index_cast %151 : i32 to index
    %c0_63 = arith.constant 0 : index
    %153 = vector.load %arg2[%152, %c0_63] : memref<1000x32xf32, #tpu.memory_space<vmem>>, vector<1x32xf32>
    %154 = tpu.concatenate %132, %139, %146, %153 in 1 : vector<1x32xf32>, vector<1x32xf32>, vector<1x32xf32>, vector<1x32xf32> -> vector<1x128xf32>
    %155 = arith.index_cast %c4_i32_51 : i32 to index
    %c0_64 = arith.constant 0 : index
    %156 = vector.load %arg3[%155, %c0_64] : memref<8x128xf32, #tpu.memory_space<vmem>>, vector<1x128xf32>
    tpu.vector_store %arg3[%155, %c0_64], %154 {strides = array<i32>} : memref<8x128xf32, #tpu.memory_space<vmem>>, vector<1x128xf32>,
    %c5_i32 = arith.constant 5 : i32
    %c4_i32_65 = arith.constant 4 : i32
    %157 = arith.muli %c5_i32, %c4_i32_65 : i32
    %158 = arith.addi %1, %157 : i32
    %c0_i32_66 = arith.constant 0 : i32
    %159 = arith.addi %158, %c0_i32_66 : i32
    %160 = arith.index_cast %159 : i32 to index
    %161 = memref.load %arg1[%160] : memref<32xi32, #tpu.memory_space<smem>>
    %162 = arith.index_cast %161 : i32 to index
    %c0_67 = arith.constant 0 : index
    %163 = vector.load %arg2[%162, %c0_67] : memref<1000x32xf32, #tpu.memory_space<vmem>>, vector<1x32xf32>
    %c4_i32_68 = arith.constant 4 : i32
    %164 = arith.muli %c5_i32, %c4_i32_68 : i32
    %165 = arith.addi %1, %164 : i32
    %c1_i32_69 = arith.constant 1 : i32
    %166 = arith.addi %165, %c1_i32_69 : i32
    %167 = arith.index_cast %166 : i32 to index
    %168 = memref.load %arg1[%167] : memref<32xi32, #tpu.memory_space<smem>>
    %169 = arith.index_cast %168 : i32 to index
    %c0_70 = arith.constant 0 : index
    %170 = vector.load %arg2[%169, %c0_70] : memref<1000x32xf32, #tpu.memory_space<vmem>>, vector<1x32xf32>
    %c4_i32_71 = arith.constant 4 : i32
    %171 = arith.muli %c5_i32, %c4_i32_71 : i32
    %172 = arith.addi %1, %171 : i32
    %c2_i32_72 = arith.constant 2 : i32
    %173 = arith.addi %172, %c2_i32_72 : i32
    %174 = arith.index_cast %173 : i32 to index
    %175 = memref.load %arg1[%174] : memref<32xi32, #tpu.memory_space<smem>>
    %176 = arith.index_cast %175 : i32 to index
    %c0_73 = arith.constant 0 : index
    %177 = vector.load %arg2[%176, %c0_73] : memref<1000x32xf32, #tpu.memory_space<vmem>>, vector<1x32xf32>
    %c4_i32_74 = arith.constant 4 : i32
    %178 = arith.muli %c5_i32, %c4_i32_74 : i32
    %179 = arith.addi %1, %178 : i32
    %c3_i32_75 = arith.constant 3 : i32
    %180 = arith.addi %179, %c3_i32_75 : i32
    %181 = arith.index_cast %180 : i32 to index
    %182 = memref.load %arg1[%181] : memref<32xi32, #tpu.memory_space<smem>>
    %183 = arith.index_cast %182 : i32 to index
    %c0_76 = arith.constant 0 : index
    %184 = vector.load %arg2[%183, %c0_76] : memref<1000x32xf32, #tpu.memory_space<vmem>>, vector<1x32xf32>
    %185 = tpu.concatenate %163, %170, %177, %184 in 1 : vector<1x32xf32>, vector<1x32xf32>, vector<1x32xf32>, vector<1x32xf32> -> vector<1x128xf32>
    %186 = arith.index_cast %c5_i32 : i32 to index
    %c0_77 = arith.constant 0 : index
    %187 = vector.load %arg3[%186, %c0_77] : memref<8x128xf32, #tpu.memory_space<vmem>>, vector<1x128xf32>
    tpu.vector_store %arg3[%186, %c0_77], %185 {strides = array<i32>} : memref<8x128xf32, #tpu.memory_space<vmem>>, vector<1x128xf32>,
    %c6_i32 = arith.constant 6 : i32
    %c4_i32_78 = arith.constant 4 : i32
    %188 = arith.muli %c6_i32, %c4_i32_78 : i32
    %189 = arith.addi %1, %188 : i32
    %c0_i32_79 = arith.constant 0 : i32
    %190 = arith.addi %189, %c0_i32_79 : i32
    %191 = arith.index_cast %190 : i32 to index
    %192 = memref.load %arg1[%191] : memref<32xi32, #tpu.memory_space<smem>>
    %193 = arith.index_cast %192 : i32 to index
    %c0_80 = arith.constant 0 : index
    %194 = vector.load %arg2[%193, %c0_80] : memref<1000x32xf32, #tpu.memory_space<vmem>>, vector<1x32xf32>
    %c4_i32_81 = arith.constant 4 : i32
    %195 = arith.muli %c6_i32, %c4_i32_81 : i32
    %196 = arith.addi %1, %195 : i32
    %c1_i32_82 = arith.constant 1 : i32
    %197 = arith.addi %196, %c1_i32_82 : i32
    %198 = arith.index_cast %197 : i32 to index
    %199 = memref.load %arg1[%198] : memref<32xi32, #tpu.memory_space<smem>>
    %200 = arith.index_cast %199 : i32 to index
    %c0_83 = arith.constant 0 : index
    %201 = vector.load %arg2[%200, %c0_83] : memref<1000x32xf32, #tpu.memory_space<vmem>>, vector<1x32xf32>
    %c4_i32_84 = arith.constant 4 : i32
    %202 = arith.muli %c6_i32, %c4_i32_84 : i32
    %203 = arith.addi %1, %202 : i32
    %c2_i32_85 = arith.constant 2 : i32
    %204 = arith.addi %203, %c2_i32_85 : i32
    %205 = arith.index_cast %204 : i32 to index
    %206 = memref.load %arg1[%205] : memref<32xi32, #tpu.memory_space<smem>>
    %207 = arith.index_cast %206 : i32 to index
    %c0_86 = arith.constant 0 : index
    %208 = vector.load %arg2[%207, %c0_86] : memref<1000x32xf32, #tpu.memory_space<vmem>>, vector<1x32xf32>
    %c4_i32_87 = arith.constant 4 : i32
    %209 = arith.muli %c6_i32, %c4_i32_87 : i32
    %210 = arith.addi %1, %209 : i32
    %c3_i32_88 = arith.constant 3 : i32
    %211 = arith.addi %210, %c3_i32_88 : i32
    %212 = arith.index_cast %211 : i32 to index
    %213 = memref.load %arg1[%212] : memref<32xi32, #tpu.memory_space<smem>>
    %214 = arith.index_cast %213 : i32 to index
    %c0_89 = arith.constant 0 : index
    %215 = vector.load %arg2[%214, %c0_89] : memref<1000x32xf32, #tpu.memory_space<vmem>>, vector<1x32xf32>
    %216 = tpu.concatenate %194, %201, %208, %215 in 1 : vector<1x32xf32>, vector<1x32xf32>, vector<1x32xf32>, vector<1x32xf32> -> vector<1x128xf32>
    %217 = arith.index_cast %c6_i32 : i32 to index
    %c0_90 = arith.constant 0 : index
    %218 = vector.load %arg3[%217, %c0_90] : memref<8x128xf32, #tpu.memory_space<vmem>>, vector<1x128xf32>
    tpu.vector_store %arg3[%217, %c0_90], %216 {strides = array<i32>} : memref<8x128xf32, #tpu.memory_space<vmem>>, vector<1x128xf32>,
    %c7_i32 = arith.constant 7 : i32
    %c4_i32_91 = arith.constant 4 : i32
    %219 = arith.muli %c7_i32, %c4_i32_91 : i32
    %220 = arith.addi %1, %219 : i32
    %c0_i32_92 = arith.constant 0 : i32
    %221 = arith.addi %220, %c0_i32_92 : i32
    %222 = arith.index_cast %221 : i32 to index
    %223 = memref.load %arg1[%222] : memref<32xi32, #tpu.memory_space<smem>>
    %224 = arith.index_cast %223 : i32 to index
    %c0_93 = arith.constant 0 : index
    %225 = vector.load %arg2[%224, %c0_93] : memref<1000x32xf32, #tpu.memory_space<vmem>>, vector<1x32xf32>
    %c4_i32_94 = arith.constant 4 : i32
    %226 = arith.muli %c7_i32, %c4_i32_94 : i32
    %227 = arith.addi %1, %226 : i32
    %c1_i32_95 = arith.constant 1 : i32
    %228 = arith.addi %227, %c1_i32_95 : i32
    %229 = arith.index_cast %228 : i32 to index
    %230 = memref.load %arg1[%229] : memref<32xi32, #tpu.memory_space<smem>>
    %231 = arith.index_cast %230 : i32 to index
    %c0_96 = arith.constant 0 : index
    %232 = vector.load %arg2[%231, %c0_96] : memref<1000x32xf32, #tpu.memory_space<vmem>>, vector<1x32xf32>
    %c4_i32_97 = arith.constant 4 : i32
    %233 = arith.muli %c7_i32, %c4_i32_97 : i32
    %234 = arith.addi %1, %233 : i32
    %c2_i32_98 = arith.constant 2 : i32
    %235 = arith.addi %234, %c2_i32_98 : i32
    %236 = arith.index_cast %235 : i32 to index
    %237 = memref.load %arg1[%236] : memref<32xi32, #tpu.memory_space<smem>>
    %238 = arith.index_cast %237 : i32 to index
    %c0_99 = arith.constant 0 : index
    %239 = vector.load %arg2[%238, %c0_99] : memref<1000x32xf32, #tpu.memory_space<vmem>>, vector<1x32xf32>
    %c4_i32_100 = arith.constant 4 : i32
    %240 = arith.muli %c7_i32, %c4_i32_100 : i32
    %241 = arith.addi %1, %240 : i32
    %c3_i32_101 = arith.constant 3 : i32
    %242 = arith.addi %241, %c3_i32_101 : i32
    %243 = arith.index_cast %242 : i32 to index
    %244 = memref.load %arg1[%243] : memref<32xi32, #tpu.memory_space<smem>>
    %245 = arith.index_cast %244 : i32 to index
    %c0_102 = arith.constant 0 : index
    %246 = vector.load %arg2[%245, %c0_102] : memref<1000x32xf32, #tpu.memory_space<vmem>>, vector<1x32xf32>
    %247 = tpu.concatenate %225, %232, %239, %246 in 1 : vector<1x32xf32>, vector<1x32xf32>, vector<1x32xf32>, vector<1x32xf32> -> vector<1x128xf32>
    %248 = arith.index_cast %c7_i32 : i32 to index
    %c0_103 = arith.constant 0 : index
    %249 = vector.load %arg3[%248, %c0_103] : memref<8x128xf32, #tpu.memory_space<vmem>>, vector<1x128xf32>
    tpu.vector_store %arg3[%248, %c0_103], %247 {strides = array<i32>} : memref<8x128xf32, #tpu.memory_space<vmem>>, vector<1x128xf32>,
    %c8_i32_104 = arith.constant 8 : i32
    return
  }
  func.func @transform_0(%arg0: i32, %arg1: memref<32xi32, #tpu.memory_space<smem>>) -> (i32, i32) {
    %c0_i32 = arith.constant 0 : i32
    %c0_i32_0 = arith.constant 0 : i32
    %c0_i32_1 = arith.constant 0 : i32
    return %c0_i32, %c0_i32_0 : i32, i32
  }
  func.func @transform_1(%arg0: i32, %arg1: memref<32xi32, #tpu.memory_space<smem>>) -> (i32, i32) {
    %c0_i32 = arith.constant 0 : i32
    %c0_i32_0 = arith.constant 0 : i32
    return %arg0, %c0_i32 : i32, i32
  }
}

</mosaic_0001>

<bundles_post_ra>
// kernel: tpu_custom_call.1
= control target key start
LH: loop header
LB: loop body
LE: loop exit
PB: predicated region body
PF: predicated region fallthrough
CT: control target
= control target key end

     0   :  { %s557_s0 = inlined_call_operand.vmem [shape: s32[32], index: 0, kind: input, shape index: {}]   ;;  %s558_s1 = inlined_call_operand.vmem [shape: f32[1000,32], index: 1, kind: input, shape index: {}]   ;;  %s559_s2 = inlined_call_operand.hbm [shape: f32[8,128], index: 2, kind: output, shape index: {}]  }
   0x1   :  { %s7_s11 = sshll.u32 %s557_s0, 4  ;;  %s8_s11 = int_to_ptr.vmem [resolvable:$true] %s7_s11 }
   0x2   :  { %s357_s12 = scalar_lea.vmem %s8_s11, 16  ;;  %p362_p1 = scmp.lt.s32.totalorder %s8_s11, %s8_s11 }
   0x3   :  { %p358_p0 = scmp.ne.s32.totalorder %s8_s11, %s357_s12  ;;  %p363_p2 = scmp.lt.s32.totalorder %s357_s12, %s357_s12 }
   0x5   :  { %p364_p3 = por %p363_p2, %p362_p1 }
   0x7   :  { %p365_p4 = pnand %p364_p3, %p358_p0 }
   0x9   :  { %368 = shalt.err (!%p365_p4)  }
   0xa   :  { %s393_s13 = smov [#allocation3]  }
   0xb   :  { %10 = dma.vmem_to_smem %s8_s11, 16, %s393_s13, [#allocation2] }
   0xc   :  { %389 = dma.done.wait [#allocation2], 16 }
   0xd   :  { %390 = vsyncadd [#allocation2], 4294967280 }
   0xe   :  { %12 = sfence }
   0xf   :  { %s329_s14 = sld [smem:[#allocation3 + $0x9]] }
  0x10   :  { %13 = vsyncpa [#allocation5], 0  ;;  %s321_s15 = sld [smem:[#allocation3 + $0x1]]  ;;  %s394_s27 = smov 32   ;;  %vm44_vm0 = vcmask 261120   ;;  %vm46_vm1 = vcmask 523264  }
  0x11   :  { %s333_s16 = sld [smem:[#allocation3 + $0xd]]  ;;  %s395_s10 = smov 64   ;;  %vm48_vm2 = vcmask 785408  }
  0x12   :  { %s325_s17 = sld [smem:[#allocation3 + $0x5]] }
  0x13   :  { %s341_s18 = sld [smem:[#allocation3 + $0x15]] }
  0x14   :  { %s337_s0 = sld [smem:[#allocation3 + $0x11]] }
  0x15   :  { %s89_s21 = scalar_lea.vmem %s558_s1, %s329_s14  ;;  %s349_s22 = sld [smem:[#allocation3 + $0x1d]] }
  0x16   :  { %v90_v0 = vld [vmem:[%s89_s21] sm:$0x1]  ;;  %s22_s25 = scalar_lea.vmem %s558_s1, %s321_s15  ;;  %s345_s26 = sld [smem:[#allocation3 + $0x19]] }
  0x17   :  { %100 = vrot.lane.b32.xlu1 %v90_v0, %s394_s27  ;;  %v23_v1 = vld [vmem:[%s22_s25] sm:$0x1]  ;;  %s121_s30 = scalar_lea.vmem %s558_s1, %s333_s16  ;;  %s326_s9 = sld [smem:[#allocation3 + $0x6]] }
  0x18   :  { %33 = vrot.lane.b32.xlu0 %v23_v1, %s394_s27  ;;  %v122_v2 = vld [vmem:[%s121_s30] sm:$0x1]  ;;  %s57_s5 = scalar_lea.vmem %s558_s1, %s325_s17  ;;  %s322_s13 = sld [smem:[#allocation3 + $0x2]] }
  0x19   :  { %v58_v3 = vld [vmem:[%s57_s5] sm:$0x1]  ;;  %s185_s8 = scalar_lea.vmem %s558_s1, %s341_s18  ;;  %s334_s17 = sld [smem:[#allocation3 + $0xe]] }
  0x1a   :  { %s153_s12 = scalar_lea.vmem %s558_s1, %s337_s0  ;;  %v186_v4 = vld [vmem:[%s185_s8] sm:$0x1]  ;;  %s330_s18 = sld [smem:[#allocation3 + $0xa]] }
  0x1b   :  { %132 = vrot.lane.b32.xlu1 %v122_v2, %s394_s27  ;;  %v154_v5 = vld [vmem:[%s153_s12] sm:$0x1]  ;;  %s249_s16 = scalar_lea.vmem %s558_s1, %s349_s22  ;;  %s342_s25 = sld [smem:[#allocation3 + $0x16]] }
  0x1c   :  { %68 = vrot.lane.b32.xlu0 %v58_v3, %s394_s27  ;;  %s217_s21 = scalar_lea.vmem %s558_s1, %s345_s26  ;;  %v250_v6 = vld [vmem:[%s249_s16] sm:$0x1]  ;;  %s338_s22 = sld [smem:[#allocation3 + $0x12]] }
  0x1d   :  { %v218_v7 = vld [vmem:[%s217_s21] sm:$0x1]  ;;  %s61_s24 = scalar_lea.vmem %s558_s1, %s326_s9  ;;  %s350_s5 = sld [smem:[#allocation3 + $0x1e]] }
  0x1e   :  { %s26_s30 = scalar_lea.vmem %s558_s1, %s322_s13  ;;  %v62_v8 = vld [vmem:[%s61_s24] sm:$0x1]  ;;  %s346_s9 = sld [smem:[#allocation3 + $0x1a]] }
  0x1f   :  { %196 = vrot.lane.b32.xlu1 %v186_v4, %s394_s27  ;;  %v27_v9 = vld [vmem:[%s26_s30] sm:$0x1]  ;;  %s125_s4 = scalar_lea.vmem %s558_s1, %s334_s17  ;;  %s327_s13 = sld [smem:[#allocation3 + $0x7]] }
  0x20   :  { %164 = vrot.lane.b32.xlu0 %v154_v5, %s394_s27  ;;  %s93_s8 = scalar_lea.vmem %s558_s1, %s330_s18  ;;  %v126_v10 = vld [vmem:[%s125_s4] sm:$0x1]  ;;  %s323_s17 = sld [smem:[#allocation3 + $0x3]] }
  0x21   :  { %v94_v11 = vld [vmem:[%s93_s8] sm:$0x1]  ;;  %s335_s18 = sld [smem:[#allocation3 + $0xf]]  ;;  %s396_s14 = smov 96  }
  0x22   :  { %s157_s16 = scalar_lea.vmem %s558_s1, %s338_s22  ;;  %s343_s22 = sld [smem:[#allocation3 + $0x17]] }
  0x23   :  { %260 = vrot.lane.b32.xlu1 %v250_v6, %s394_s27  ;;  %v158_v13 = vld [vmem:[%s157_s16] sm:$0x1]  ;;  %s253_s21 = scalar_lea.vmem %s558_s1, %s350_s5  ;;  %s339_s5 = sld [smem:[#allocation3 + $0x13]] }
  0x24   :  { %228 = vrot.lane.b32.xlu0 %v218_v7, %s394_s27  ;;  %s189_s27 = scalar_lea.vmem %s558_s1, %s342_s25  ;;  %s221_s24 = scalar_lea.vmem %s558_s1, %s346_s9  ;;  %v254_v14 = vld [vmem:[%s253_s21] sm:$0x1] }
  0x25   :  { %v190_v12 = vld [vmem:[%s189_s27] sm:$0x1]  ;;  %s331_s25 = sld [smem:[#allocation3 + $0xb]]  ;;  %s65_s30 = scalar_lea.vmem %s558_s1, %s327_s13 }
  0x26   :  { %v222_v15 = vld [vmem:[%s221_s24] sm:$0x1]  ;;  %s30_s4 = scalar_lea.vmem %s558_s1, %s323_s17  ;;  %s351_s9 = sld [smem:[#allocation3 + $0x1f]] }
  0x27   :  { %72 = vrot.lane.b32.xlu1 %v62_v8, %s395_s10  ;;  %v66_v16 = vld [vmem:[%s65_s30] sm:$0x1]  ;;  %s129_s8 = scalar_lea.vmem %s558_s1, %s335_s18  ;;  %s347_s13 = sld [smem:[#allocation3 + $0x1b]] }
  0x28   :  { %37 = vrot.lane.b32.xlu0 %v27_v9, %s395_s10  ;;  %v31_v17 = vld [vmem:[%s30_s4] sm:$0x1]  ;;  %s324_s28 = sld [smem:[#allocation3 + $0x4]] }
  0x29   :  { %v130_v18 = vld [vmem:[%s129_s8] sm:$0x1]  ;;  %s161_s20 = scalar_lea.vmem %s558_s1, %s339_s5  ;;  %s17_s29 = sld [smem:[#allocation3]] }
  0x2a   :  { %v162_v21 = vld [vmem:[%s161_s20] sm:$0x1]  ;;  %s332_s30 = sld [smem:[#allocation3 + $0xc]] }
  0x2b   :  { %136 = vrot.lane.b32.xlu1 %v126_v10, %s395_s10  ;;  %s97_s27 = scalar_lea.vmem %s558_s1, %s331_s25  ;;  %s495_s5 = sld [smem:[#allocation3 + $0x14]] }
  0x2c   :  { %104 = vrot.lane.b32.xlu0 %v94_v11, %s395_s10  ;;  %v98_v19 = vld [vmem:[%s97_s27] sm:$0x1]  ;;  %s257_s0 = scalar_lea.vmem %s558_s1, %s351_s9  ;;  %s500_s9 = sld [smem:[#allocation3 + $0x10]] }
  0x2d   :  { %s225_s25 = scalar_lea.vmem %s558_s1, %s347_s13  ;;  %v258_v22 = vld [vmem:[%s257_s0] sm:$0x1]  ;;  %s505_s13 = sld [smem:[#allocation3 + $0x1c]] }
  0x2e   :  { %v226_v23 = vld [vmem:[%s225_s25] sm:$0x1]  ;;  %s53_s4 = scalar_lea.vmem %s558_s1, %s324_s28 }
  0x2f   :  { %200 = vrot.lane.b32.xlu1 %v190_v12, %s395_s10  ;;  %s18_s8 = scalar_lea.vmem %s558_s1, %s17_s29  ;;  %v54_v38 = vld [vmem:[%s53_s4] sm:$0x1] }
  0x30   :  { %168 = vrot.lane.b32.xlu0 %v158_v13, %s395_s10  ;;  %v19_v40 = vld [vmem:[%s18_s8] sm:$0x1]  ;;  %s117_s27 = scalar_lea.vmem %s558_s1, %s332_s30 }
  0x31   :  { %v118_v44 = vld [vmem:[%s117_s27] sm:$0x1]  ;;  %s181_s20 = scalar_lea.vmem %s558_s1, %s495_s5 }
  0x32   :  { %s149_s0 = scalar_lea.vmem %s558_s1, %s500_s9  ;;  %v182_v54 = vld [vmem:[%s181_s20] sm:$0x1] }
  0x33   :  { %264 = vrot.lane.b32.xlu1 %v254_v14, %s395_s10  ;;  %v150_v57 = vld [vmem:[%s149_s0] sm:$0x1]  ;;  %s245_s25 = scalar_lea.vmem %s558_s1, %s505_s13 }
  0x34   :  { %232 = vrot.lane.b32.xlu0 %v222_v15, %s395_s10  ;;  %s193_s10 = scalar_lea.vmem %s558_s1, %s343_s22  ;;  %s328_s22 = sld [smem:[#allocation3 + $0x8]]  ;;  %v246_v0 = vld [vmem:[%s245_s25] sm:$0x1] }
  0x35   :  { %v194_v20 = vld [vmem:[%s193_s10] sm:$0x1]  ;;  %s510_s10 = sld [smem:[#allocation3 + $0x18]] }
  0x37   :  { %76 = vrot.lane.b32.xlu1 %v66_v16, %s396_s14 }
  0x38   :  { %41 = vrot.lane.b32.xlu0 %v31_v17, %s396_s14 }
  0x3a   :  { %s85_s16 = scalar_lea.vmem %s558_s1, %s328_s22 }
  0x3b   :  { %140 = vrot.lane.b32.xlu1 %v130_v18, %s396_s14  ;;  %v86_v47 = vld [vmem:[%s85_s16] sm:$0x1]  ;;  %s213_s30 = scalar_lea.vmem %s558_s1, %s510_s10  ;;  %s397_s1 = smov [#allocation4]  }
  0x3c   :  { %108 = vrot.lane.b32.xlu0 %v98_v19, %s396_s14  ;;  %v214_v3 = vld [vmem:[%s213_s30] sm:$0x1]  ;;  %s281_s22 = sshll.u32 %s397_s1, 4  ;;  %s282_s22 = int_to_ptr.vmem [resolvable:$true] %s281_s22 }
  0x3d   :  { %s369_s26 = scalar_lea.vmem %s282_s22, 128  ;;  %p374_p6 = scmp.lt.s32.totalorder %s282_s22, %s282_s22 }
  0x3e   :  { %p370_p5 = scmp.ne.s32.totalorder %s282_s22, %s369_s26  ;;  %p375_p7 = scmp.lt.s32.totalorder %s369_s26, %s369_s26 }
  0x3f   :  { %204 = vrot.lane.b32.xlu1 %v194_v20, %s396_s14 }
  0x40   :  { %172 = vrot.lane.b32.xlu0 %v162_v21, %s396_s14  ;;  %p376_p8 = por %p375_p7, %p374_p6 }
  0x42   :  { %p377_p9 = pnand %p376_p8, %p370_p5 }
  0x43   :  { %268 = vrot.lane.b32.xlu1 %v258_v22, %s396_s14 }
  0x44   :  { %236 = vrot.lane.b32.xlu0 %v226_v23, %s396_s14 }
  0x89   :  { %v101_v24 = vpop.permute.xlu1 %100 }
  0x8a   :  { %v34_v25 = vpop.permute.xlu0 %33  ;;  %v111_v53 = vsel %vm44_vm0, %v86_v47, %v101_v24 }
  0x8b   :  { %v45_v43 = vsel %vm44_vm0, %v19_v40, %v34_v25 }
  0x8d   :  { %v133_v26 = vpop.permute.xlu1 %132 }
  0x8e   :  { %v69_v27 = vpop.permute.xlu0 %68  ;;  %v143_v52 = vsel %vm44_vm0, %v118_v44, %v133_v26 }
  0x8f   :  { %v79_v42 = vsel %vm44_vm0, %v54_v38, %v69_v27 }
  0x91   :  { %v197_v28 = vpop.permute.xlu1 %196 }
  0x92   :  { %v165_v29 = vpop.permute.xlu0 %164  ;;  %v207_v62 = vsel %vm44_vm0, %v182_v54, %v197_v28 }
  0x93   :  { %v175_v63 = vsel %vm44_vm0, %v150_v57, %v165_v29 }
  0x95   :  { %v488_v30 = vpop.permute.xlu1 %260 }
  0x96   :  { %v490_v31 = vpop.permute.xlu0 %228  ;;  %v271_v8 = vsel %vm44_vm0, %v246_v0, %v488_v30 }
  0x97   :  { %v239_v9 = vsel %vm44_vm0, %v214_v3, %v490_v31 }
  0x99   :  { %v73_v32 = vpop.permute.xlu1 %72 }
  0x9a   :  { %v38_v33 = vpop.permute.xlu0 %37  ;;  %v80_v45 = vsel %vm46_vm1, %v79_v42, %v73_v32 }
  0x9b   :  { %v47_v48 = vsel %vm46_vm1, %v45_v43, %v38_v33 }
  0x9d   :  { %v137_v34 = vpop.permute.xlu1 %136 }
  0x9e   :  { %v105_v35 = vpop.permute.xlu0 %104  ;;  %v144_v55 = vsel %vm46_vm1, %v143_v52, %v137_v34 }
  0x9f   :  { %v112_v58 = vsel %vm46_vm1, %v111_v53, %v105_v35 }
  0xa1   :  { %v201_v36 = vpop.permute.xlu1 %200 }
  0xa2   :  { %v169_v37 = vpop.permute.xlu0 %168  ;;  %v208_v1 = vsel %vm46_vm1, %v207_v62, %v201_v36 }
  0xa3   :  { %v176_v4 = vsel %vm46_vm1, %v175_v63, %v169_v37 }
  0xa5   :  { %v265_v39 = vpop.permute.xlu1 %264 }
  0xa6   :  { %v233_v41 = vpop.permute.xlu0 %232  ;;  %v272_v10 = vsel %vm46_vm1, %v271_v8, %v265_v39 }
  0xa7   :  { %v240_v12 = vsel %vm46_vm1, %v239_v9, %v233_v41 }
  0xa9   :  { %v77_v46 = vpop.permute.xlu1 %76 }
  0xaa   :  { %v81_v49 = vsel %vm48_vm2, %v80_v45, %v77_v46  ;;  %v42_v50 = vpop.permute.xlu0 %41 }
  0xab   :  { %82 = vst [vmem:[#allocation4 + $0x1] sm:$0x1] %v81_v49  ;;  %v49_v51 = vsel %vm48_vm2, %v47_v48, %v42_v50 }
  0xac   :  { %50 = vst [vmem:[#allocation4] sm:$0x1] %v49_v51 }
  0xad   :  { %v141_v56 = vpop.permute.xlu1 %140 }
  0xae   :  { %v145_v59 = vsel %vm48_vm2, %v144_v55, %v141_v56  ;;  %v109_v60 = vpop.permute.xlu0 %108 }
  0xaf   :  { %146 = vst [vmem:[#allocation4 + $0x3] sm:$0x1] %v145_v59  ;;  %v113_v61 = vsel %vm48_vm2, %v112_v58, %v109_v60 }
  0xb0   :  { %114 = vst [vmem:[#allocation4 + $0x2] sm:$0x1] %v113_v61 }
  0xb1   :  { %v205_v2 = vpop.permute.xlu1 %204 }
  0xb2   :  { %v209_v5 = vsel %vm48_vm2, %v208_v1, %v205_v2  ;;  %v173_v6 = vpop.permute.xlu0 %172 }
  0xb3   :  { %210 = vst [vmem:[#allocation4 + $0x5] sm:$0x1] %v209_v5  ;;  %v177_v7 = vsel %vm48_vm2, %v176_v4, %v173_v6 }
  0xb4   :  { %178 = vst [vmem:[#allocation4 + $0x4] sm:$0x1] %v177_v7 }
  0xb5   :  { %v269_v11 = vpop.permute.xlu1 %268 }
  0xb6   :  { %v273_v13 = vsel %vm48_vm2, %v272_v10, %v269_v11  ;;  %v237_v14 = vpop.permute.xlu0 %236 }
  0xb7   :  { %274 = vst [vmem:[#allocation4 + $0x7] sm:$0x1] %v273_v13  ;;  %v241_v15 = vsel %vm48_vm2, %v240_v12, %v237_v14 }
  0xb8   :  { %242 = vst [vmem:[#allocation4 + $0x6] sm:$0x1] %v241_v15 }
  0xb9   :  { %380 = shalt.err (!%p377_p9)
}
  0xba   :  { %284 = dma.vmem_to_hbm [thread:$0]  %s282_s22, 128, %s559_s2, [#allocation5]  }
  0xbb   :  { %391 = dma.done.wait [#allocation5], 128  }
  0xbc   :  { %392 = vsyncadd [#allocation5], 4294967168 }
  0xbd   :  { %288 = vsyncpa [#allocation5], 1 }

</bundles_post_ra>
